<compile_context>
chip_gen: v6e
topology: v6e:2x2x1
jax: 0.10.0
libtpu: 0.0.40
codegen_flags: <defaults>
</compile_context>

<pallas_src>
import functools

import jax
import jax.numpy as jnp
from jax.experimental import pallas as pl
from jax.experimental.pallas import tpu as pltpu


def _sigma_mlp_kernel(x_ref, wg_ref, wu_ref, wd_ref, o_ref, acc_ref):
    """One (M-tile, I-tile) step of the fused gated MLP.

    x_ref  : (tm, H)   activation tile (resident across the j axis)
    wg_ref : (H, tn)   gate_proj^T slice
    wu_ref : (H, tn)   up_proj^T   slice
    wd_ref : (tn, H)   down_proj^T slice
    o_ref  : (tm, H)   output tile (written on the last j step)
    acc_ref: (tm, H)   f32 VMEM accumulator for the reduction over I
    """
    j = pl.program_id(1)

    @pl.when(j == 0)
    def _():
        acc_ref[...] = jnp.zeros_like(acc_ref)

    x = x_ref[...]

    # gate/up projections for this I-slice -> (tm, tn), f32 accumulation (MXU).
    g = jnp.dot(x, wg_ref[...], preferred_element_type=jnp.float32)
    u = jnp.dot(x, wu_ref[...], preferred_element_type=jnp.float32)

    # SiLU(g) * u on the (tm, tn) slice only (sigmoid -> EUP, muls -> VPU).
    h = (g * jax.nn.sigmoid(g)) * u

    # Partial down_proj for this I-slice, accumulated in f32.
    acc_ref[...] += jnp.dot(h.astype(x.dtype), wd_ref[...],
                            preferred_element_type=jnp.float32)

    @pl.when(j == pl.num_programs(1) - 1)
    def _():
        o_ref[...] = acc_ref[...].astype(o_ref.dtype)


def _sublane_multiple(dtype):
    # Sublane packing per dtype: f32 -> 8, bf16 -> 16, int8/fp8 -> 32.
    return {4: 8, 2: 16, 1: 32}.get(jnp.dtype(dtype).itemsize, 8)


def _round_up(x, m):
    return ((x + m - 1) // m) * m


@functools.partial(jax.jit, static_argnames=("tm", "tn"))
def sigma_mlp(x, wg_t, wu_t, wd_t, *, tm=256, tn=512):
    """SigmaMLP forward: down_proj(silu(gate_proj(x)) * up_proj(x)).

    x    : [B, S, H]
    wg_t : [H, I]  (transpose of PyTorch gate_proj.weight)
    wu_t : [H, I]  (transpose of PyTorch up_proj.weight)
    wd_t : [I, H]  (transpose of PyTorch down_proj.weight)

    Defaults (tm=256, tn=512) are sized for v6e/v7x; on v5e tm=128 already
    saturates the 128-row MXU.
    """
    B, S, H = x.shape
    I = wg_t.shape[1]
    M = B * S
    x2d = x.reshape(M, H)

    # --- M tiling: clamp for tiny problems, pad M instead of asserting. -----
    sub = _sublane_multiple(x.dtype)
    tm_eff = _round_up(min(tm, _round_up(M, sub)), sub)
    M_pad = _round_up(M, tm_eff)
    if M_pad != M:
        x2d = jnp.pad(x2d, ((0, M_pad - M), (0, 0)))

    # --- I tiling: multiple of 128 that divides I, else take the full axis. -
    if I <= tn or I % tn != 0 or tn % 128 != 0:
        tn_eff = I
    else:
        tn_eff = tn

    grid = (M_pad // tm_eff, I // tn_eff)

    # --- VMEM budget (double-buffered tiles + f32 accumulator). -------------
    a_bytes = jnp.dtype(x.dtype).itemsize
    w_bytes = jnp.dtype(wg_t.dtype).itemsize
    vmem_need = (2 * tm_eff * H * a_bytes                       # x tiles
                 + 2 * (2 * H * tn_eff + tn_eff * H) * w_bytes  # weight tiles
                 + tm_eff * H * 4                               # accumulator
                 + 2 * tm_eff * H * a_bytes)                    # output tiles
    vmem_limit = min(max(vmem_need + (8 << 20), 32 << 20), 128 << 20)

    cost = pl.CostEstimate(
        flops=6 * M_pad * H * I,
        transcendentals=M_pad * I,
        bytes_accessed=(2 * M_pad * H * a_bytes
                        + 3 * H * I * w_bytes * grid[0]),
    )

    out2d = pl.pallas_call(
        _sigma_mlp_kernel,
        out_shape=jax.ShapeDtypeStruct((M_pad, H), x.dtype),
        grid_spec=pltpu.PrefetchScalarGridSpec(
            num_scalar_prefetch=0,
            grid=grid,
            in_specs=[
                pl.BlockSpec((tm_eff, H), lambda i, j: (i, 0)),   # x tile
                pl.BlockSpec((H, tn_eff), lambda i, j: (0, j)),   # gate_proj^T
                pl.BlockSpec((H, tn_eff), lambda i, j: (0, j)),   # up_proj^T
                pl.BlockSpec((tn_eff, H), lambda i, j: (j, 0)),   # down_proj^T
            ],
            out_specs=pl.BlockSpec((tm_eff, H), lambda i, j: (i, 0)),
            scratch_shapes=[pltpu.VMEM((tm_eff, H), jnp.float32)],
        ),
        compiler_params=pltpu.CompilerParams(
            dimension_semantics=("parallel", "arbitrary"),
            vmem_limit_bytes=vmem_limit,
        ),
        cost_estimate=cost,
    )(x2d, wg_t, wu_t, wd_t)

    if M_pad != M:
        out2d = out2d[:M]
    return out2d.reshape(B, S, H)


def reference_mlp(x, wg_t, wu_t, wd_t):
    """Pure-JAX reference mirroring the kernel's precision choices."""
    xf = x.astype(jnp.float32)
    g = xf @ wg_t.astype(jnp.float32)
    u = xf @ wu_t.astype(jnp.float32)
    h = (jax.nn.silu(g) * u).astype(x.dtype).astype(jnp.float32)
    return (h @ wd_t.astype(jnp.float32)).astype(x.dtype)


if __name__ == "__main__":
    key = jax.random.PRNGKey(0)

    # --- Test 1: tiny f32 config (matches the module's toy shapes) ----------
    batch, seq = 2, 8
    hidden_size, intermediate_size = 32, 64
    kx, kg, ku, kd = jax.random.split(key, 4)
    scale = 0.05

    x = jax.random.normal(kx, (batch, seq, hidden_size), dtype=jnp.float32)
    wg_t = scale * jax.random.normal(kg, (hidden_size, intermediate_size),
                                     dtype=jnp.float32)
    wu_t = scale * jax.random.normal(ku, (hidden_size, intermediate_size),
                                     dtype=jnp.float32)
    wd_t = scale * jax.random.normal(kd, (intermediate_size, hidden_size),
                                     dtype=jnp.float32)

    out = jax.block_until_ready(sigma_mlp(x, wg_t, wu_t, wd_t))
    ref = reference_mlp(x, wg_t, wu_t, wd_t)
    assert out.shape == (batch, seq, hidden_size)
    assert jnp.allclose(out, ref, atol=1e-5, rtol=1e-5)

    # --- Test 2: bf16, 128-aligned dims, multi-step I reduction + M padding --
    B2, S2, H2, I2 = 2, 70, 256, 512          # M=140 -> padded to tile
    k2x, k2g, k2u, k2d = jax.random.split(jax.random.PRNGKey(1), 4)
    x2 = jax.random.normal(k2x, (B2, S2, H2), dtype=jnp.float32).astype(jnp.bfloat16)
    wg2 = (scale * jax.random.normal(k2g, (H2, I2), jnp.float32)).astype(jnp.bfloat16)
    wu2 = (scale * jax.random.normal(k2u, (H2, I2), jnp.float32)).astype(jnp.bfloat16)
    wd2 = (scale * jax.random.normal(k2d, (I2, H2), jnp.float32)).astype(jnp.bfloat16)

    out2 = jax.block_until_ready(sigma_mlp(x2, wg2, wu2, wd2, tm=128, tn=128))
    ref2 = reference_mlp(x2, wg2, wu2, wd2)
    assert out2.shape == (B2, S2, H2)
    assert jnp.allclose(out2.astype(jnp.float32), ref2.astype(jnp.float32),
                        atol=5e-2, rtol=5e-2)

    print("KERNEL_OK")
</pallas_src>

<mosaic_0001>
module attributes {stable_mosaic.version = 11 : i64} {
  func.func @_sigma_mlp_kernel(%arg0: i32, %arg1: i32, %arg2: memref<16x32xf32, #tpu.memory_space<vmem>>, %arg3: memref<32x64xf32, #tpu.memory_space<vmem>>, %arg4: memref<32x64xf32, #tpu.memory_space<vmem>>, %arg5: memref<64x32xf32, #tpu.memory_space<vmem>>, %arg6: memref<16x32xf32, #tpu.memory_space<vmem>>, %arg7: memref<16x32xf32, #tpu.memory_space<vmem>>) attributes {dimension_semantics = [#tpu.dimension_semantics<parallel>, #tpu.dimension_semantics<arbitrary>], iteration_bounds = array<i64: 1, 1>, scalar_prefetch = 0 : i64, scratch_operands = 1 : i64, tpu.core_type = #tpu.core_type<tc>, window_params = [{transform_indices = @transform_0, window_bounds = array<i64: 16, 32>}, {transform_indices = @transform_1, window_bounds = array<i64: 32, 64>}, {transform_indices = @transform_2, window_bounds = array<i64: 32, 64>}, {transform_indices = @transform_3, window_bounds = array<i64: 64, 32>}, {transform_indices = @transform_4, window_bounds = array<i64: 16, 32>}]} {
    %c0_i32 = arith.constant 0 : i32
    %0 = arith.cmpi eq, %arg1, %c0_i32 : i32
    %1 = arith.extui %0 : i1 to i32
    %c0_i32_0 = arith.constant 0 : i32
    %2 = arith.cmpi ne, %1, %c0_i32_0 : i32
    scf.if %2 {
      %cst_17 = arith.constant 0.000000e+00 : f32
      %23 = vector.broadcast %cst_17 : f32 to vector<16x32xf32>
      %c0_18 = arith.constant 0 : index
      %c0_19 = arith.constant 0 : index
      %24 = vector.load %arg7[%c0_18, %c0_19] : memref<16x32xf32, #tpu.memory_space<vmem>>, vector<16x32xf32>
      tpu.vector_store %arg7[%c0_18, %c0_19], %23 {strides = array<i32>} : memref<16x32xf32, #tpu.memory_space<vmem>>, vector<16x32xf32>,
    } else {
    }
    %c0 = arith.constant 0 : index
    %c0_1 = arith.constant 0 : index
    %3 = vector.load %arg2[%c0, %c0_1] : memref<16x32xf32, #tpu.memory_space<vmem>>, vector<16x32xf32>
    %c0_2 = arith.constant 0 : index
    %c0_3 = arith.constant 0 : index
    %4 = vector.load %arg3[%c0_2, %c0_3] : memref<32x64xf32, #tpu.memory_space<vmem>>, vector<32x64xf32>
    %cst = arith.constant dense<0.000000e+00> : vector<16x64xf32>
    %5 = tpu.matmul %3, %4, %cst {dimension_numbers = #tpu.dot_dimension_numbers<[1], [0], [0], [1], [0, 0, 1, 1], [], []>} : vector<16x32xf32>, vector<32x64xf32>, vector<16x64xf32> -> vector<16x64xf32>
    %c0_4 = arith.constant 0 : index
    %c0_5 = arith.constant 0 : index
    %6 = vector.load %arg4[%c0_4, %c0_5] : memref<32x64xf32, #tpu.memory_space<vmem>>, vector<32x64xf32>
    %cst_6 = arith.constant dense<0.000000e+00> : vector<16x64xf32>
    %7 = tpu.matmul %3, %6, %cst_6 {dimension_numbers = #tpu.dot_dimension_numbers<[1], [0], [0], [1], [0, 0, 1, 1], [], []>} : vector<16x32xf32>, vector<32x64xf32>, vector<16x64xf32> -> vector<16x64xf32>
    %8 = arith.negf %5 : vector<16x64xf32>
    %9 = math.exp %8 : vector<16x64xf32>
    %cst_7 = arith.constant 1.000000e+00 : f32
    %10 = vector.broadcast %cst_7 : f32 to vector<16x64xf32>
    %11 = arith.addf %10, %9 : vector<16x64xf32>
    %12 = arith.divf %10, %11 : vector<16x64xf32>
    %13 = arith.mulf %5, %12 : vector<16x64xf32>
    %14 = arith.mulf %13, %7 : vector<16x64xf32>
    %c0_8 = arith.constant 0 : index
    %c0_9 = arith.constant 0 : index
    %15 = vector.load %arg7[%c0_8, %c0_9] : memref<16x32xf32, #tpu.memory_space<vmem>>, vector<16x32xf32>
    %c0_10 = arith.constant 0 : index
    %c0_11 = arith.constant 0 : index
    %16 = vector.load %arg5[%c0_10, %c0_11] : memref<64x32xf32, #tpu.memory_space<vmem>>, vector<64x32xf32>
    %cst_12 = arith.constant dense<0.000000e+00> : vector<16x32xf32>
    %17 = tpu.matmul %14, %16, %cst_12 {dimension_numbers = #tpu.dot_dimension_numbers<[1], [0], [0], [1], [0, 0, 1, 1], [], []>} : vector<16x64xf32>, vector<64x32xf32>, vector<16x32xf32> -> vector<16x32xf32>
    %18 = arith.addf %15, %17 : vector<16x32xf32>
    %c0_13 = arith.constant 0 : index
    %c0_14 = arith.constant 0 : index
    %19 = vector.load %arg7[%c0_13, %c0_14] : memref<16x32xf32, #tpu.memory_space<vmem>>, vector<16x32xf32>
    tpu.vector_store %arg7[%c0_13, %c0_14], %18 {strides = array<i32>} : memref<16x32xf32, #tpu.memory_space<vmem>>, vector<16x32xf32>,
    %c0_i32_15 = arith.constant 0 : i32
    %20 = arith.cmpi eq, %arg1, %c0_i32_15 : i32
    %21 = arith.extui %20 : i1 to i32
    %c0_i32_16 = arith.constant 0 : i32
    %22 = arith.cmpi ne, %21, %c0_i32_16 : i32
    scf.if %22 {
      %c0_17 = arith.constant 0 : index
      %c0_18 = arith.constant 0 : index
      %23 = vector.load %arg7[%c0_17, %c0_18] : memref<16x32xf32, #tpu.memory_space<vmem>>, vector<16x32xf32>
      %c0_19 = arith.constant 0 : index
      %c0_20 = arith.constant 0 : index
      %24 = vector.load %arg6[%c0_19, %c0_20] : memref<16x32xf32, #tpu.memory_space<vmem>>, vector<16x32xf32>
      tpu.vector_store %arg6[%c0_19, %c0_20], %23 {strides = array<i32>} : memref<16x32xf32, #tpu.memory_space<vmem>>, vector<16x32xf32>,
    } else {
    }
    return
  }
  func.func @transform_0(%arg0: i32, %arg1: i32) -> (i32, i32) {
    %c0_i32 = arith.constant 0 : i32
    %c0_i32_0 = arith.constant 0 : i32
    return %arg0, %c0_i32 : i32, i32
  }
  func.func @transform_1(%arg0: i32, %arg1: i32) -> (i32, i32) {
    %c0_i32 = arith.constant 0 : i32
    %c0_i32_0 = arith.constant 0 : i32
    return %c0_i32, %arg1 : i32, i32
  }
  func.func @transform_2(%arg0: i32, %arg1: i32) -> (i32, i32) {
    %c0_i32 = arith.constant 0 : i32
    %c0_i32_0 = arith.constant 0 : i32
    return %c0_i32, %arg1 : i32, i32
  }
  func.func @transform_3(%arg0: i32, %arg1: i32) -> (i32, i32) {
    %c0_i32 = arith.constant 0 : i32
    %c0_i32_0 = arith.constant 0 : i32
    return %arg1, %c0_i32 : i32, i32
  }
  func.func @transform_4(%arg0: i32, %arg1: i32) -> (i32, i32) {
    %c0_i32 = arith.constant 0 : i32
    %c0_i32_0 = arith.constant 0 : i32
    return %arg0, %c0_i32 : i32, i32
  }
}

</mosaic_0001>

<bundles_post_ra>
// kernel: sigma_mlp.1
= control target key start
LH: loop header
LB: loop body
LE: loop exit
PB: predicated region body
PF: predicated region fallthrough
CT: control target
= control target key end

     0   :  { %vm22_vm0 = vcmask 261120   ;;  %s528_s0 = inlined_call_operand.vmem [shape: f32[16,32], index: 0, kind: input, shape index: {}]   ;;  %s529_s1 = inlined_call_operand.vmem [shape: f32[32,64], index: 1, kind: input, shape index: {}]   ;;  %s530_s2 = inlined_call_operand.vmem [shape: f32[32,64], index: 2, kind: input, shape index: {}]   ;;  %s531_s3 = inlined_call_operand.vmem [shape: f32[64,32], index: 3, kind: input, shape index: {}]   ;;  %s532_s4 = inlined_call_operand.hbm [shape: f32[16,32], index: 4, kind: output, shape index: {}]  }
   0x1   :  { %v30_v0 = vld [vmem:[%s529_s1 + $0x18] sm:$0xff]  ;;  %v29_v1 = vld [vmem:[%s529_s1 + $0x10] sm:$0xff]  ;;  %v25_v2 = vld [vmem:[%s528_s0] sm:$0xff] }
   0x2   :  { %357 = vmatprep.subr.mxu1 %v30_v0  ;;  %v28_v3 = vld [vmem:[%s529_s1 + $0x8] sm:$0xff]  ;;  %365 = vmatprep.mubr.msk.f32.mxu1 %vm22_vm0, %v25_v2 }
   0x3   :  { %358 = vmatpush3.msra.mxu1 %v30_v0 }
   0x4   :  { %359 = vmatprep.subr.mxu1 %v29_v1 }
   0x5   :  { %9 = vsyncpa [#allocation4], 0  ;;  %360 = vmatpush3.msra.mxu1 %v29_v1  ;;  %v27_v4 = vld [vmem:[%s529_s1] sm:$0xff]  ;;  %v26_v5 = vld [vmem:[%s528_s0 + $0x8] sm:$0xff]  ;;  %v432_v18 = vmov 0.0   ;;  %vm218_vm1 = vcmask 523264  }
   0x6   :  { %361 = vmatprep.subr.mxu1 %v28_v3  ;;  %v116_v6 = vld [vmem:[%s530_s2 + $0x18] sm:$0xff]  ;;  %v115_v7 = vld [vmem:[%s530_s2 + $0x10] sm:$0xff]  ;;  %v114_v8 = vld [vmem:[%s530_s2 + $0x8] sm:$0xff]  ;;  %24 = vst.msk [vmem:[#allocation2 + $0x8] sm:$0xff] %vm22_vm0, %v432_v18 }
   0x7   :  { %362 = vmatpush3.msra.mxu1 %v28_v3  ;;  %v113_v9 = vld [vmem:[%s530_s2] sm:$0xff]  ;;  %v217_v10 = vld [vmem:[%s531_s3 + $0x38] sm:$0xff]  ;;  %v216_v11 = vld [vmem:[%s531_s3 + $0x30] sm:$0xff]  ;;  %23 = vst.msk [vmem:[#allocation2] sm:$0xff] %vm22_vm0, %v432_v18 }
   0x8   :  { %363 = vmatprep.subr.mxu1 %v27_v4  ;;  %379 = vmatprep.subr.mxu0 %v217_v10  ;;  %v215_v12 = vld [vmem:[%s531_s3 + $0x28] sm:$0xff]  ;;  %v214_v13 = vld [vmem:[%s531_s3 + $0x20] sm:$0xff]  ;;  %v213_v14 = vld [vmem:[%s531_s3 + $0x18] sm:$0xff] }
   0x9   :  { %364 = vmatpush3.msra.mxu1 %v27_v4  ;;  %380 = vmatpush3.msra.mxu0 %v217_v10  ;;  %v212_v15 = vld [vmem:[%s531_s3 + $0x10] sm:$0xff]  ;;  %v211_v16 = vld [vmem:[%s531_s3 + $0x8] sm:$0xff]  ;;  %v210_v17 = vld [vmem:[%s531_s3] sm:$0xff]  ;;  %s433_s3 = smov [#allocation3]  }
   0xa   :  { %366 = vmatmul.mubr.msk.f32.vlgmr.msra.gmra.mxu1 %vm22_vm0, %v26_v5  ;;  %368 = vmatprep.subr.mxu1 %v116_v6  ;;  %s316_s22 = sshll.u32 %s433_s3, 4  ;;  %s317_s22 = int_to_ptr.vmem [resolvable:$true] %s316_s22 }
   0xb   :  { %369 = vmatpush3.msra.mxu1 %v116_v6  ;;  %376 = vmatprep.mubr.msk.f32.mxu1 %vm22_vm0, %v25_v2  ;;  %s410_s23 = scalar_lea.vmem %s317_s22, 256  ;;  %p415_p1 = scmp.lt.s32.totalorder %s317_s22, %s317_s22 }
   0xc   :  { %370 = vmatprep.subr.mxu1 %v115_v7  ;;  %381 = vmatprep.subr.mxu0 %v216_v11  ;;  %p411_p0 = scmp.ne.s32.totalorder %s317_s22, %s410_s23  ;;  %p416_p2 = scmp.lt.s32.totalorder %s410_s23, %s410_s23 }
   0xd   :  { %371 = vmatpush3.msra.mxu1 %v115_v7  ;;  %382 = vmatpush3.msra.mxu0 %v216_v11  ;;  %v209_v35 = vld [vmem:[#allocation2 + $0x8] sm:$0xff] }
   0xe   :  { %372 = vmatprep.subr.mxu1 %v114_v8  ;;  %383 = vmatprep.subr.mxu0 %v215_v12  ;;  %v208_v37 = vld [vmem:[#allocation2] sm:$0xff]  ;;  %p417_p3 = por %p416_p2, %p415_p1 }
   0xf   :  { %373 = vmatpush3.msra.mxu1 %v114_v8  ;;  %384 = vmatpush3.msra.mxu0 %v215_v12 }
  0x10   :  { %374 = vmatprep.subr.mxu1 %v113_v9  ;;  %385 = vmatprep.subr.mxu0 %v214_v13  ;;  %p418_p4 = pnand %p417_p3, %p411_p0 }
  0x11   :  { %375 = vmatpush3.msra.mxu1 %v113_v9  ;;  %386 = vmatpush3.msra.mxu0 %v214_v13 }
  0x12   :  { %377 = vmatmul.mubr.msk.f32.vlgmr.msra.gmra.mxu1 %vm22_vm0, %v26_v5  ;;  %387 = vmatprep.subr.mxu0 %v213_v14 }
  0x13   :  { %388 = vmatpush3.msra.mxu0 %v213_v14 }
  0x14   :  { %389 = vmatprep.subr.mxu0 %v212_v15 }
  0x15   :  { %390 = vmatpush3.msra.mxu0 %v212_v15 }
  0x16   :  { %391 = vmatprep.subr.mxu0 %v211_v16 }
  0x17   :  { %392 = vmatpush3.msra.mxu0 %v211_v16 }
  0x18   :  { %393 = vmatprep.subr.mxu0 %v210_v17 }
  0x19   :  { %394 = vmatpush3.msra.mxu0 %v210_v17 }
  0xca   :  { %v367_v19 = vpop.f32.mrf.mxu1 }
  0xcb   :  { %v332_v20 = vmul.f32 -1.442695, %v367_v19 }
  0xcc   :  { %v104_v21 = vpop.f32.mrf.mxu1 }
  0xcd   :  { %402 = vpow2.f32 %v332_v20  ;;  %v331_v22 = vmul.f32 -1.442695, %v104_v21 }
  0xcf   :  { %404 = vpow2.f32 %v331_v22 }
  0xd2   :  { %v378_v28 = vpop.f32.mrf.mxu1 }
  0xd4   :  { %v183_v32 = vpop.f32.mrf.mxu1 }
  0xda   :  { %v403_v23 = vpop.eup %402 }
  0xdb   :  { %v199_v24 = vadd.f32 1.0, %v403_v23 }
  0xdc   :  { %v405_v25 = vpop.eup %404 }
  0xdd   :  { %406 = vrcp.f32 %v199_v24  ;;  %v198_v26 = vadd.f32 1.0, %v405_v25 }
  0xdf   :  { %408 = vrcp.f32 %v198_v26 }
  0xea   :  { %v407_v27 = vpop.eup %406 }
  0xeb   :  { %v205_v30 = vmul.f32 %v407_v27, %v367_v19 }
  0xec   :  { %v409_v29 = vpop.eup %408 }
  0xed   :  { %v204_v31 = vmul.f32 %v409_v29, %v104_v21  ;;  %v207_v34 = vmul.f32 %v378_v28, %v205_v30 }
  0xef   :  { %v206_v33 = vmul.f32 %v204_v31, %v183_v32 }
  0xf1   :  { %395 = vmatprep.mubr.msk.f32.mxu0 %vm218_vm1, %v206_v33 }
  0xf2   :  { %396 = vmatmul.mubr.msk.f32.vlgmr.msra.gmra.mxu0 %vm218_vm1, %v207_v34 }
 0x1b2   :  { %v397_v36 = vpop.f32.mrf.mxu0 }
 0x1b3   :  { %v301_v38 = vadd.f32 %v397_v36, %v209_v35 }
 0x1b4   :  { %v291_v39 = vpop.f32.mrf.mxu0 }
 0x1b5   :  { %303 = vst.msk [vmem:[#allocation2 + $0x8] sm:$0xff] %vm22_vm0, %v301_v38  ;;  %v300_v40 = vadd.f32 %v291_v39, %v208_v37 }
 0x1b7   :  { %302 = vst.msk [vmem:[#allocation2] sm:$0xff] %vm22_vm0, %v300_v40 }
 0x1bc   :  { %v308_v41 = vld [vmem:[#allocation2 + $0x8] sm:$0xff] }
 0x1bd   :  { %310 = vst.msk [vmem:[#allocation3 + $0x8] sm:$0xff] %vm22_vm0, %v308_v41 }
 0x1be   :  { %v307_v42 = vld [vmem:[#allocation2] sm:$0xff] }
 0x1bf   :  { %309 = vst.msk [vmem:[#allocation3] sm:$0xff] %vm22_vm0, %v307_v42 }
 0x1c0   :  { %421 = shalt.err (!%p418_p4)
}
 0x1c1   :  { %s434_s24 = smov 128   ;;  %s435_s25 = smov 8  }
 0x1c2   :  { %322 = dma.vmem_to_hbm [thread:$0]  %s317_s22, 256, %s532_s4, [#allocation4], %s434_s24, %s434_s24, %s435_s25  }
 0x1c3   :  { %430 = dma.done.wait [#allocation4], 256  }
 0x1c4   :  { %431 = vsyncadd [#allocation4], 4294967040 }
 0x1c5   :  { %326 = vsyncpa [#allocation4], 1 }

</bundles_post_ra>
